<compile_context>
chip_gen: v6e
topology: v6e:2x2x1
jax: 0.10.0
libtpu: 0.0.40
codegen_flags: <defaults>
</compile_context>

<pallas_src>
import functools

import jax
import jax.numpy as jnp
from jax.experimental import pallas as pl
from jax.experimental.pallas import tpu as pltpu


def _mish_kernel(x_ref, o_ref, *, approx_recip):
    x = x_ref[...].astype(jnp.float32)
    # tanh(softplus(x)) = t*(t+2) / (t*(t+2)+2), t = exp(x).
    # Clamp the exp argument; for x > 20, tanh(softplus(x)) == 1 in f32,
    # so mish(x) == x (avoids exp overflow in the discarded branch).
    t = jnp.exp(jnp.minimum(x, 20.0))
    u = t * (t + 2.0)
    if approx_recip:
        # 16-bit outputs: EUP approximate reciprocal (~2^-12 rel. error) is
        # far below bf16/fp16 precision and frees the exact-divide cost.
        tanh_sp = u * pl.reciprocal(u + 2.0, approx=True)
    else:
        tanh_sp = u / (u + 2.0)
    y = jnp.where(x > 20.0, x, x * tanh_sp)
    o_ref[...] = y.astype(o_ref.dtype)


_MAX_LANES = 1024
_TARGET_TILE_BYTES = 4 * 1024 * 1024  # per-buffer tile target (I/O dtype)


def _cdiv(a, b):
    return -(-a // b)


def _round_up(a, m):
    return _cdiv(a, m) * m


def _num_tensorcores():
    """Best-effort TensorCore count per device (perf-only; 1 is always safe)."""
    try:
        info = pltpu.get_tpu_info()
        for name in ("num_tensorcores", "tensorcore_count", "num_cores", "core_count"):
            v = getattr(info, name, None)
            if isinstance(v, int) and v > 0:
                return v
    except Exception:
        pass
    try:
        kind = jax.devices()[0].device_kind.lower()
        if "v7" in kind:
            return 2
    except Exception:
        pass
    return 1


def _vmem_limit_bytes():
    """Scoped VMEM limit: 3/4 of physical capacity, clamped to [32, 64] MiB."""
    cap = None
    try:
        cap = getattr(pltpu.get_tpu_info(), "vmem_capacity_bytes", None)
    except Exception:
        pass
    if not cap:
        cap = 64 * 1024 * 1024  # conservative (v7x minimum)
    return int(max(32 * 1024 * 1024, min(3 * cap // 4, 64 * 1024 * 1024)))


def _choose_layout(n: int, dtype_bytes: int, num_tc: int):
    """Pick (lanes, pad, rows, block_rows) for a flat length n."""
    # Packed sublane count for the I/O dtype: 8 f32, 16 bf16/fp16, 32 int8/fp8.
    sub = 8 * max(1, 4 // dtype_bytes)

    if n % 128 == 0:
        # Widest power-of-two multiple of 128 (<=1024) that divides n: the
        # reshape below is then a pure bitcast (no pad/slice round trip).
        lanes = _MAX_LANES
        while lanes > 128 and n % lanes != 0:
            lanes //= 2
        pad = 0
    else:
        # Ragged path already pays one pad copy; keep the layout lane-dense.
        lanes = _MAX_LANES
        pad = (-n) % lanes
    rows = (n + pad) // lanes

    # ~4 MiB per tile buffer; double-buffered in+out ~= 16 MiB VMEM, safe under
    # every chip's scoped limit and v7x's 64 MiB physical VMEM.
    target_rows = max(sub, ((_TARGET_TILE_BYTES // (lanes * dtype_bytes)) // sub) * sub)

    if rows <= target_rows:
        block_rows = rows  # single block equal to full sublane extent is legal
        if num_tc >= 2 and rows >= 2 * sub:
            # Split into 2 grid steps only when there are 2 TensorCores.
            half = _round_up(_cdiv(rows, 2), sub)
            if half < rows:
                block_rows = half
    else:
        block_rows = target_rows
        if num_tc >= 2:
            # Prefer an even grid so both TensorCores get equal work.
            if _cdiv(rows, block_rows) % 2 == 1:
                b = block_rows - sub
                lo = max(sub, block_rows // 2)
                while b >= lo:
                    if _cdiv(rows, b) % 2 == 0:
                        block_rows = b
                        break
                    b -= sub
    return lanes, pad, rows, block_rows


def mish(x: jax.Array) -> jax.Array:
    """Elementwise Mish. Accepts any shape/dtype; returns same shape/dtype."""
    orig_shape = x.shape
    orig_dtype = x.dtype
    n = x.size
    if n == 0:
        return x

    dtype_bytes = jnp.dtype(orig_dtype).itemsize
    num_tc = _num_tensorcores()
    lanes, pad, rows, block_rows = _choose_layout(n, dtype_bytes, num_tc)

    flat = x.reshape(-1)
    if pad:
        flat = jnp.pad(flat, (0, pad))
    x2d = flat.reshape(rows, lanes)  # bitcast reshape in the common (pad==0) case

    # Approximate reciprocal only when the output precision can't see it.
    use_approx = dtype_bytes <= 2

    grid = (_cdiv(rows, block_rows),)
    out2d = pl.pallas_call(
        functools.partial(_mish_kernel, approx_recip=use_approx),
        out_shape=jax.ShapeDtypeStruct((rows, lanes), orig_dtype),
        grid_spec=pltpu.PrefetchScalarGridSpec(
            num_scalar_prefetch=0,
            grid=grid,
            in_specs=[pl.BlockSpec((block_rows, lanes), lambda i: (i, 0))],
            out_specs=pl.BlockSpec((block_rows, lanes), lambda i: (i, 0)),
        ),
        compiler_params=pltpu.CompilerParams(
            dimension_semantics=("parallel",),
            vmem_limit_bytes=_vmem_limit_bytes(),
        ),
        cost_estimate=pl.CostEstimate(
            flops=7 * rows * lanes,
            transcendentals=2 * rows * lanes,
            bytes_accessed=2 * rows * lanes * dtype_bytes,
        ),
    )(x2d)

    out_flat = out2d.reshape(-1)
    if pad:
        out_flat = out_flat[:n]
    return out_flat.reshape(orig_shape)


def mish_reference(x):
    xf = x.astype(jnp.float32)
    sp = jnp.maximum(xf, 0.0) + jnp.log1p(jnp.exp(-jnp.abs(xf)))
    return (xf * jnp.tanh(sp)).astype(x.dtype)


if __name__ == "__main__":
    key = jax.random.PRNGKey(0)

    # Primary test: shape implied by the PyTorch module usage (NCHW).
    x = jax.random.normal(key, (2, 4, 16, 16), dtype=jnp.float32) * 3.0
    y = jax.block_until_ready(mish(x))
    y_ref = mish_reference(x)
    assert y.shape == x.shape and y.dtype == x.dtype
    assert jnp.allclose(y, y_ref, atol=1e-5, rtol=1e-5)

    # Ragged size (exercises the wide-pad path + masked/partial handling).
    k2 = jax.random.PRNGKey(1)
    x2 = jax.random.normal(k2, (3, 5, 7), dtype=jnp.float32) * 10.0
    y2 = jax.block_until_ready(mish(x2))
    assert jnp.allclose(y2, mish_reference(x2), atol=1e-5, rtol=1e-5)

    # Multi-row grid + bf16 I/O (narrow dtype stays narrow in HBM,
    # dtype-aware sublane rounding, approx reciprocal path).
    k3 = jax.random.PRNGKey(2)
    x3 = jax.random.normal(k3, (4, 4, 64, 64), dtype=jnp.bfloat16) * 4.0
    y3 = jax.block_until_ready(mish(x3))
    assert y3.dtype == jnp.bfloat16 and y3.shape == x3.shape
    assert jnp.allclose(
        y3.astype(jnp.float32), mish_reference(x3).astype(jnp.float32),
        atol=2e-2, rtol=2e-2,
    )

    print("KERNEL_OK")
</pallas_src>

<mosaic_0001>
module attributes {stable_mosaic.version = 11 : i64} {
  func.func @_mish_kernel(%arg0: i32, %arg1: memref<2x1024xf32, #tpu.memory_space<vmem>>, %arg2: memref<2x1024xf32, #tpu.memory_space<vmem>>) attributes {dimension_semantics = [#tpu.dimension_semantics<parallel>], iteration_bounds = array<i64: 1>, scalar_prefetch = 0 : i64, scratch_operands = 0 : i64, tpu.core_type = #tpu.core_type<tc>, window_params = [{transform_indices = @transform_0, window_bounds = array<i64: 2, 1024>}, {transform_indices = @transform_1, window_bounds = array<i64: 2, 1024>}]} {
    %c0 = arith.constant 0 : index
    %c0_0 = arith.constant 0 : index
    %0 = vector.load %arg1[%c0, %c0_0] : memref<2x1024xf32, #tpu.memory_space<vmem>>, vector<2x1024xf32>
    %cst = arith.constant 2.000000e+01 : f32
    %1 = vector.broadcast %cst : f32 to vector<2x1024xf32>
    %2 = arith.minimumf %0, %1 : vector<2x1024xf32>
    %3 = math.exp %2 : vector<2x1024xf32>
    %cst_1 = arith.constant 2.000000e+00 : f32
    %4 = vector.broadcast %cst_1 : f32 to vector<2x1024xf32>
    %5 = arith.addf %3, %4 : vector<2x1024xf32>
    %6 = arith.mulf %3, %5 : vector<2x1024xf32>
    %cst_2 = arith.constant 2.000000e+00 : f32
    %7 = vector.broadcast %cst_2 : f32 to vector<2x1024xf32>
    %8 = arith.addf %6, %7 : vector<2x1024xf32>
    %9 = arith.divf %6, %8 : vector<2x1024xf32>
    %cst_3 = arith.constant 2.000000e+01 : f32
    %10 = vector.broadcast %cst_3 : f32 to vector<2x1024xf32>
    %11 = arith.cmpf ogt, %0, %10 : vector<2x1024xf32>
    %12 = arith.mulf %0, %9 : vector<2x1024xf32>
    %13 = arith.select %11, %0, %12 : vector<2x1024xi1>, vector<2x1024xf32>
    %c0_4 = arith.constant 0 : index
    %c0_5 = arith.constant 0 : index
    %14 = vector.load %arg2[%c0_4, %c0_5] : memref<2x1024xf32, #tpu.memory_space<vmem>>, vector<2x1024xf32>
    tpu.vector_store %arg2[%c0_4, %c0_5], %13 {strides = array<i32>} : memref<2x1024xf32, #tpu.memory_space<vmem>>, vector<2x1024xf32>,
    return
  }
  func.func @transform_0(%arg0: i32) -> (i32, i32) {
    %c0_i32 = arith.constant 0 : i32
    %c0_i32_0 = arith.constant 0 : i32
    return %arg0, %c0_i32 : i32, i32
  }
  func.func @transform_1(%arg0: i32) -> (i32, i32) {
    %c0_i32 = arith.constant 0 : i32
    %c0_i32_0 = arith.constant 0 : i32
    return %arg0, %c0_i32 : i32, i32
  }
}

</mosaic_0001>

<bundles_post_ra>
// kernel: tpu_custom_call.1
= control target key start
LH: loop header
LB: loop body
LE: loop exit
PB: predicated region body
PF: predicated region fallthrough
CT: control target
= control target key end

     0   :  { %6 = vsyncpa [#allocation3], 0  ;;  %s134_s0 = inlined_call_operand.hbm [shape: f32[2,1024], index: 0, kind: input, shape index: {}]   ;;  %s135_s1 = inlined_call_operand.hbm [shape: f32[2,1024], index: 1, kind: output, shape index: {}]  }
   0x1   :  { %7 = vsyncpa [#allocation4], 0  ;;  %s116_s6 = smov [#allocation2]  }
   0x2   :  { %s14_s7 = sshll.u32 %s116_s6, 4  ;;  %s15_s7 = int_to_ptr.vmem [resolvable:$true] %s14_s7 }
   0x3   :  { %s80_s8 = scalar_lea.vmem %s15_s7, 256  ;;  %p85_p1 = scmp.lt.s32.totalorder %s15_s7, %s15_s7 }
   0x4   :  { %p81_p0 = scmp.ne.s32.totalorder %s15_s7, %s80_s8  ;;  %p86_p2 = scmp.lt.s32.totalorder %s80_s8, %s80_s8 }
   0x6   :  { %p87_p3 = por %p86_p2, %p85_p1 }
   0x8   :  { %p88_p4 = pnand %p87_p3, %p81_p0 }
   0xa   :  { %91 = shalt.err (!%p88_p4)
}
   0xb   :  { %17 = dma.hbm_to_vmem [thread:$0]  %s134_s0, 256, %s15_s7, [#allocation3]  }
   0xc   :  { %112 = dma.done.wait [#allocation3], 256  }
   0xd   :  { %113 = vsyncadd [#allocation3], 4294967040  ;;  %v21_v0 = vld [vmem:[#allocation2] sm:$0xff]  ;;  %v22_v1 = vld [vmem:[#allocation2 + $0x8] sm:$0xff]  ;;  %s117_s0 = smov [#allocation5]  }
   0xe   :  { %v23_v2 = vmin.f32 %v21_v0, 20.0  ;;  %v24_v3 = vmin.f32 %v22_v1, 20.0  ;;  %vm39_vm0 = vcmp.gt.f32.partialorder %v21_v0, 20.0  ;;  %s53_s11 = sshll.u32 %s117_s0, 4  ;;  %vm40_vm1 = vcmp.gt.f32.partialorder %v22_v1, 20.0  ;;  %s54_s11 = int_to_ptr.vmem [resolvable:$true] %s53_s11 }
   0xf   :  { %s92_s12 = scalar_lea.vmem %s54_s11, 256  ;;  %p97_p6 = scmp.lt.s32.totalorder %s54_s11, %s54_s11 }
  0x10   :  { %v25_v4 = vmul.f32 1.442695, %v23_v2  ;;  %v27_v5 = vmul.f32 1.442695, %v24_v3  ;;  %p93_p5 = scmp.ne.s32.totalorder %s54_s11, %s92_s12  ;;  %p98_p7 = scmp.lt.s32.totalorder %s92_s12, %s92_s12 }
  0x12   :  { %64 = vpow2.f32 %v25_v4  ;;  %p99_p8 = por %p98_p7, %p97_p6 }
  0x13   :  { %66 = vpow2.f32 %v27_v5 }
  0x14   :  { %p100_p9 = pnand %p99_p8, %p93_p5 }
  0x1f   :  { %v65_v6 = vpop.eup %64 }
  0x20   :  { %v67_v7 = vpop.eup %66  ;;  %v29_v8 = vadd.f32 2.0, %v65_v6 }
  0x21   :  { %v30_v9 = vadd.f32 2.0, %v67_v7 }
  0x22   :  { %v31_v10 = vmul.f32 %v65_v6, %v29_v8 }
  0x23   :  { %v32_v11 = vmul.f32 %v67_v7, %v30_v9 }
  0x24   :  { %v33_v12 = vadd.f32 2.0, %v31_v10 }
  0x25   :  { %v34_v13 = vadd.f32 2.0, %v32_v11 }
  0x26   :  { %68 = vrcp.f32 %v33_v12 }
  0x27   :  { %70 = vrcp.f32 %v34_v13 }
  0x33   :  { %v69_v14 = vpop.eup %68 }
  0x34   :  { %v71_v15 = vpop.eup %70  ;;  %v36_v16 = vmul.f32 %v69_v14, %v31_v10 }
  0x35   :  { %v38_v17 = vmul.f32 %v71_v15, %v32_v11 }
  0x36   :  { %v41_v18 = vmul.f32 %v36_v16, %v21_v0 }
  0x37   :  { %v42_v19 = vmul.f32 %v38_v17, %v22_v1 }
  0x38   :  { %v43_v20 = vsel %vm39_vm0, %v21_v0, %v41_v18 }
  0x39   :  { %45 = vst [vmem:[#allocation5] sm:$0xff] %v43_v20  ;;  %v44_v21 = vsel %vm40_vm1, %v22_v1, %v42_v19 }
  0x3a   :  { %46 = vst [vmem:[#allocation5 + $0x8] sm:$0xff] %v44_v21 }
  0x3b   :  { %103 = shalt.err (!%p100_p9)
}
  0x3c   :  { %56 = dma.vmem_to_hbm [thread:$0]  %s54_s11, 256, %s135_s1, [#allocation4]  }
  0x3d   :  { %114 = dma.done.wait [#allocation4], 256  }
  0x3e   :  { %115 = vsyncadd [#allocation4], 4294967040 }
  0x3f   :  { %60 = vsyncpa [#allocation3], 1 }
  0x40   :  { %61 = vsyncpa [#allocation4], 1 }

</bundles_post_ra>
